<compile_context>
chip_gen: v5e
topology: v5e:2x2
jax: 0.10.0
libtpu: 0.0.40
codegen_flags: <defaults>
</compile_context>

<pallas_src>
import math

import jax
import jax.numpy as jnp
from jax.experimental import pallas as pl
from jax.experimental.pallas import tpu as pltpu

_SQRT_2_OVER_PI = math.sqrt(2.0 / math.pi)


def _gelu_kernel(x_ref, o_ref):
    # Upcast once to f32, compute, cast once on the store. Horner form:
    #   inner = sqrt(2/pi) * (x + 0.044715 x^3) = x * (c0 + c1 * x^2)
    #   y     = 0.5*x*(1 + tanh(inner)) = 0.5*x + 0.5*x*tanh(inner)
    x = x_ref[...].astype(jnp.float32)
    c0 = jnp.float32(_SQRT_2_OVER_PI)
    c1 = jnp.float32(0.044715 * _SQRT_2_OVER_PI)
    x2 = x * x
    inner = x * (c0 + c1 * x2)
    half_x = jnp.float32(0.5) * x
    y = half_x + half_x * jnp.tanh(inner)
    o_ref[...] = y.astype(o_ref.dtype)


def _gelu_jnp(x):
    """Plain-jnp fallback for the sub-128-element tail (same f32 opmath)."""
    xf = x.astype(jnp.float32)
    inner = xf * (jnp.float32(_SQRT_2_OVER_PI)
                  + jnp.float32(0.044715 * _SQRT_2_OVER_PI) * (xf * xf))
    half_x = jnp.float32(0.5) * xf
    return (half_x + half_x * jnp.tanh(inner)).astype(x.dtype)


def _tpu_generation():
    try:
        kind = jax.devices()[0].device_kind.lower()
    except Exception:
        return "unknown"
    if "v5" in kind and ("lite" in kind or "5e" in kind):
        return "v5e"
    if "v6" in kind:
        return "v6e"
    if "v7" in kind:
        return "v7x"
    return "unknown"


# Per-generation block byte target and scoped-VMEM limit (bytes).
_BLOCK_TARGET = {
    "v5e": 3 << 20,      # ~0.82 TB/s HBM: 3 MiB already amortizes 0.35 us/step
    "v6e": 8 << 20,      # 128 MiB VMEM, long steps fine
    "v7x": 6 << 20,      # 64 MiB physical VMEM -> keep 2x(in+out) well under 48 MiB
    "unknown": 4 << 20,
}
_VMEM_LIMIT = {
    "v5e": 64 << 20,
    "v6e": 64 << 20,
    "v7x": 48 << 20,
    "unknown": 48 << 20,
}


def _choose_width(total):
    """Largest lane-dense last dim (multiple of 128) that divides `total`,
    else 128 (remainder handled as a jnp tail)."""
    for c in (4096, 2048, 1024, 512, 256, 128):
        if total >= c and total % c == 0:
            return c
    return 128


def _choose_row_tile(rows, width, itemsize, target_bytes):
    """Byte-targeted, sublane-aligned row tile with >=8 grid steps when possible
    (v7x: two TensorCores each need several steps to hide DMA)."""
    sub = {4: 8, 2: 16, 1: 32}.get(itemsize, 8)
    if rows <= sub:
        return rows  # single full-extent block (allowed: equals full array dim)
    row_bytes = width * itemsize
    t = max(sub, (target_bytes // row_bytes) // sub * sub)
    t = min(t, rows)
    max_blocks = rows // sub
    desired = min(8, max_blocks)
    if desired > 1 and (-(-rows // t)) < desired:
        t = ((-(-rows // desired)) + sub - 1) // sub * sub
        t = max(sub, min(t, rows))
    return t


def gelu_pallas(x):
    """Tanh-approx GELU, elementwise, matching the PyTorch module."""
    orig_shape = x.shape
    total = x.size
    if total == 0:
        return x

    dtype = x.dtype
    itemsize = jnp.dtype(dtype).itemsize
    flat = x.reshape(-1)

    width = _choose_width(total)
    bulk = (total // width) * width

    gen = _tpu_generation()
    pieces = []

    if bulk > 0:
        x2d = (flat if bulk == total else flat[:bulk]).reshape(bulk // width, width)
        rows = x2d.shape[0]
        row_tile = _choose_row_tile(rows, width, itemsize, _BLOCK_TARGET[gen])
        grid = (pl.cdiv(rows, row_tile),)

        out2d = pl.pallas_call(
            _gelu_kernel,
            out_shape=jax.ShapeDtypeStruct((rows, width), dtype),
            grid_spec=pltpu.PrefetchScalarGridSpec(
                num_scalar_prefetch=0,
                grid=grid,
                in_specs=[pl.BlockSpec((row_tile, width), lambda i: (i, 0))],
                out_specs=pl.BlockSpec((row_tile, width), lambda i: (i, 0)),
            ),
            compiler_params=pltpu.CompilerParams(
                dimension_semantics=("parallel",),
                vmem_limit_bytes=_VMEM_LIMIT[gen],
            ),
            cost_estimate=pl.CostEstimate(
                flops=8 * bulk,
                transcendentals=bulk,
                bytes_accessed=2 * bulk * itemsize,
            ),
        )(x2d)
        pieces.append(out2d.reshape(-1))

    if bulk < total:
        # Sub-128-element tail: plain jnp (avoids full-array pad+slice HBM copies).
        pieces.append(_gelu_jnp(flat[bulk:]))

    out_flat = pieces[0] if len(pieces) == 1 else jnp.concatenate(pieces)
    return out_flat.reshape(orig_shape)


def gelu_ref(x):
    c = math.sqrt(2.0 / math.pi)
    xf = x.astype(jnp.float32)
    y = 0.5 * xf * (1.0 + jnp.tanh(c * (xf + 0.044715 * jnp.power(xf, 3))))
    return y.astype(x.dtype)


if __name__ == "__main__":
    key = jax.random.PRNGKey(0)
    # batch=2, seq=8, hidden=32 (small shapes consistent with the elementwise module)
    x = jax.random.normal(key, (2, 8, 32), dtype=jnp.float32)

    out = gelu_pallas(x)
    jax.block_until_ready(out)

    ref = gelu_ref(x)
    assert out.shape == x.shape and out.dtype == x.dtype
    assert jnp.allclose(out, ref, atol=1e-5, rtol=1e-5), "mismatch vs reference"

    # Non-multiple-of-128 element count: exercises the bulk+tail path (no pad/slice).
    x2 = jax.random.normal(jax.random.PRNGKey(1), (3, 5, 7), dtype=jnp.float32)
    out2 = gelu_pallas(x2)
    jax.block_until_ready(out2)
    assert jnp.allclose(out2, gelu_ref(x2), atol=1e-5, rtol=1e-5)

    # bf16 input: f32 opmath, cast-on-store.
    x3 = jax.random.normal(jax.random.PRNGKey(2), (2, 16, 256), dtype=jnp.bfloat16)
    out3 = gelu_pallas(x3)
    jax.block_until_ready(out3)
    assert jnp.allclose(out3.astype(jnp.float32),
                        gelu_ref(x3).astype(jnp.float32), atol=2e-2, rtol=2e-2)

    print("KERNEL_OK")
</pallas_src>

<mosaic_0001>
module attributes {stable_mosaic.version = 11 : i64} {
  func.func @_gelu_kernel(%arg0: i32, %arg1: memref<1x512xf32, #tpu.memory_space<vmem>>, %arg2: memref<1x512xf32, #tpu.memory_space<vmem>>) attributes {dimension_semantics = [#tpu.dimension_semantics<parallel>], iteration_bounds = array<i64: 1>, scalar_prefetch = 0 : i64, scratch_operands = 0 : i64, tpu.core_type = #tpu.core_type<tc>, window_params = [{transform_indices = @transform_0, window_bounds = array<i64: 1, 512>}, {transform_indices = @transform_1, window_bounds = array<i64: 1, 512>}]} {
    %c0 = arith.constant 0 : index
    %c0_0 = arith.constant 0 : index
    %0 = vector.load %arg1[%c0, %c0_0] : memref<1x512xf32, #tpu.memory_space<vmem>>, vector<1x512xf32>
    %1 = arith.mulf %0, %0 : vector<1x512xf32>
    %cst = arith.constant 0.0356774069 : f32
    %2 = vector.broadcast %cst : f32 to vector<1x512xf32>
    %3 = arith.mulf %2, %1 : vector<1x512xf32>
    %cst_1 = arith.constant 0.797884583 : f32
    %4 = vector.broadcast %cst_1 : f32 to vector<1x512xf32>
    %5 = arith.addf %4, %3 : vector<1x512xf32>
    %6 = arith.mulf %0, %5 : vector<1x512xf32>
    %cst_2 = arith.constant 5.000000e-01 : f32
    %7 = vector.broadcast %cst_2 : f32 to vector<1x512xf32>
    %8 = arith.mulf %7, %0 : vector<1x512xf32>
    %9 = math.tanh %6 : vector<1x512xf32>
    %10 = arith.mulf %8, %9 : vector<1x512xf32>
    %11 = arith.addf %8, %10 : vector<1x512xf32>
    %c0_3 = arith.constant 0 : index
    %c0_4 = arith.constant 0 : index
    %12 = vector.load %arg2[%c0_3, %c0_4] : memref<1x512xf32, #tpu.memory_space<vmem>>, vector<1x512xf32>
    tpu.vector_store %arg2[%c0_3, %c0_4], %11 {strides = array<i32>} : memref<1x512xf32, #tpu.memory_space<vmem>>, vector<1x512xf32>,
    return
  }
  func.func @transform_0(%arg0: i32) -> (i32, i32) {
    %c0_i32 = arith.constant 0 : i32
    %c0_i32_0 = arith.constant 0 : i32
    return %arg0, %c0_i32 : i32, i32
  }
  func.func @transform_1(%arg0: i32) -> (i32, i32) {
    %c0_i32 = arith.constant 0 : i32
    %c0_i32_0 = arith.constant 0 : i32
    return %arg0, %c0_i32 : i32, i32
  }
}

</mosaic_0001>

<bundles_post_ra>
// kernel: tpu_custom_call.1
= control target key start
LH: loop header
LB: loop body
LE: loop exit
PB: predicated region body
PF: predicated region fallthrough
CT: control target
= control target key end

     0   :  { %6 = vsyncpa [#allocation3], 0  ;;  %s128_s0 = inlined_call_operand.hbm [shape: f32[1,512], index: 0, kind: input, shape index: {}]   ;;  %s129_s1 = inlined_call_operand.hbm [shape: f32[1,512], index: 1, kind: output, shape index: {}]  }
   0x1   :  { %7 = vsyncpa [#allocation4], 0  ;;  %s13_s8 = sshll.u32 %s128_s0, 4  ;;  %s110_s9 = smov [#allocation2]   ;;  %s14_s8 = int_to_ptr.hbm [resolvable:$true] %s13_s8 }
   0x2   :  { %s15_s10 = sshll.u32 %s110_s9, 4  ;;  %s16_s10 = int_to_ptr.vmem [resolvable:$true] %s15_s10 }
   0x3   :  { %18 = dma.hbm_to_vmem [thread:$0]  %s14_s8, 64, %s16_s10, [#allocation3]  }
   0x4   :  { %106 = dma.done.wait [#allocation3], 64  }
   0x5   :  { %107 = vsyncadd [#allocation3], 4294967232  ;;  %v23_v0 = vld [vmem:[#allocation2] sm:$0xf]  ;;  %v32_v6 = vlaneseq  ;;  %s111_s11 = smov [#allocation5]   ;;  %s44_s14 = sshll.u32 %s129_s1, 4  ;;  %s45_s14 = int_to_ptr.hbm [resolvable:$true] %s44_s14 }
   0x6   :  { %v24_v1 = vmul.f32 %v23_v0, %v23_v0  ;;  %v28_v5 = vmul.f32 0.5, %v23_v0  ;;  %s42_s12 = sshll.u32 %s111_s11, 4  ;;  %s43_s12 = int_to_ptr.vmem [resolvable:$true] %s42_s12 }
   0x7   :  { %vm34_vm0 = vcmp.lt.s32.totalorder %v32_v6, 512 }
   0x8   :  { %v25_v2 = vmul.f32 0.035677407, %v24_v1 }
   0xa   :  { %v26_v3 = vadd.f32 0.7978846, %v25_v2 }
   0xc   :  { %v27_v4 = vmul.f32 %v26_v3, %v23_v0 }
   0xe   :  { %56 = vtanh.f32 %v27_v4 }
  0x14   :  { %v57_v7 = vpop.eup %56 }
  0x15   :  { %v30_v8 = vmul.f32 %v57_v7, %v28_v5 }
  0x17   :  { %v31_v9 = vadd.f32 %v30_v8, %v28_v5 }
  0x19   :  { %36 = vst.msk [vmem:[#allocation5] sm:$0xf] %vm34_vm0, %v31_v9 }
  0x1a   :  { %47 = dma.vmem_to_hbm [thread:$0]  %s43_s12, 64, %s45_s14, [#allocation4]  }
  0x1b   :  { %108 = dma.done.wait [#allocation4], 64  }
  0x1c   :  { %109 = vsyncadd [#allocation4], 4294967232 }
  0x1d   :  { %52 = vsyncpa [#allocation3], 1 }
  0x1e   :  { %53 = vsyncpa [#allocation4], 1 }

</bundles_post_ra>
